<compile_context>
chip_gen: v6e
topology: v6e:2x2x1
jax: 0.10.0
libtpu: 0.0.40
codegen_flags: <defaults>
</compile_context>

<pallas_src>
import jax
import jax.numpy as jnp
from jax.experimental import pallas as pl
from jax.experimental.pallas import tpu as pltpu


def dqn_kernel(x_ref, w1_ref, b1_ref, w2_ref, b2_ref, w3_ref, b3_ref, o_ref):
    # In-kernel cast to bf16 for the MXU (x arrives in HBM as f32 only once).
    x = x_ref[...].astype(jnp.bfloat16)
    # Layer 1: Linear (bf16 MXU, f32 accumulate) + bias + ReLU in f32.
    h1 = jnp.dot(x, w1_ref[...], preferred_element_type=jnp.float32)
    h1 = jnp.maximum(h1 + b1_ref[...], 0.0).astype(jnp.bfloat16)
    # Layer 2: Linear + bias + ReLU.
    h2 = jnp.dot(h1, w2_ref[...], preferred_element_type=jnp.float32)
    h2 = jnp.maximum(h2 + b2_ref[...], 0.0).astype(jnp.bfloat16)
    # Layer 3: Linear (output width lane-padded to 128); store as bf16.
    out = jnp.dot(h2, w3_ref[...], preferred_element_type=jnp.float32)
    o_ref[...] = (out + b3_ref[...]).astype(o_ref.dtype)


def prepare_params(params):
    """One-time (outside the forward path) pad + cast of the weights.

    Returns (w1, b1, w2, b2, w3_padded, b3_padded, n_actions) with weights in
    bf16 (MXU operands) and biases in f32, the last layer lane-padded to a
    multiple of 128 so the kernel's output store is lane-dense.
    """
    w1, b1, w2, b2, w3, b3 = params
    n_actions = w3.shape[1]
    NP = max(128, pl.cdiv(n_actions, 128) * 128)
    w3p = jnp.zeros((w3.shape[0], NP), jnp.float32).at[:, :n_actions].set(w3)
    b3p = jnp.zeros((1, NP), jnp.float32).at[:, :n_actions].set(b3)
    return (
        w1.astype(jnp.bfloat16), b1.astype(jnp.float32),
        w2.astype(jnp.bfloat16), b2.astype(jnp.float32),
        w3p.astype(jnp.bfloat16), b3p.astype(jnp.float32),
        n_actions,
    )


def dqn_forward(x, prepared, *, tb=512):
    w1, b1, w2, b2, w3, b3, n_actions = prepared
    B, in_dim = x.shape
    h1_dim = w1.shape[1]
    h2_dim = w2.shape[1]
    NP = w3.shape[1]

    # --- batch tiling: prefer >=2 grid steps (v7x megacore), rows % 8 == 0 ---
    half = max(8, (((B + 1) // 2 + 7) // 8) * 8)
    TB = min(max(8, (tb // 8) * 8), half)
    B_pad = pl.cdiv(B, TB) * TB
    x_p = jnp.pad(x, ((0, B_pad - B), (0, 0))) if B_pad != B else x
    x_p = x_p.astype(jnp.float32)

    grid = (B_pad // TB,)
    const = lambda arr: pl.BlockSpec(arr.shape, lambda i: (0, 0))

    flops = 2 * B_pad * (in_dim * h1_dim + h1_dim * h2_dim + h2_dim * NP)
    bytes_accessed = (
        x_p.size * 4                                   # f32 x read
        + (w1.size + w2.size + w3.size) * 2            # bf16 weights
        + (b1.size + b2.size + b3.size) * 4            # f32 biases
        + B_pad * NP * 2                               # bf16 output write
    )

    out = pl.pallas_call(
        dqn_kernel,
        out_shape=jax.ShapeDtypeStruct((B_pad, NP), jnp.bfloat16),
        grid=grid,
        in_specs=[
            pl.BlockSpec((TB, in_dim), lambda i: (i, 0)),   # batch-tiled x
            const(w1), const(b1),                           # VMEM-resident
            const(w2), const(b2),
            const(w3), const(b3),
        ],
        out_specs=pl.BlockSpec((TB, NP), lambda i: (i, 0)),
        compiler_params=pltpu.CompilerParams(
            dimension_semantics=("parallel",),   # megacore sharding on v7x
        ),
        cost_estimate=pl.CostEstimate(
            flops=flops, transcendentals=0, bytes_accessed=bytes_accessed),
    )(x_p, w1, b1, w2, b2, w3, b3)

    return out[:B, :n_actions].astype(jnp.float32)


def init_params(key, n_observations, n_actions):
    """Deterministic synthetic init (uniform, PyTorch-Linear-style bound)."""
    in_dim = n_observations + 10
    dims = [(in_dim, 128), (128, 128), (128, n_actions)]
    params = []
    for fan_in, fan_out in dims:
        key, kw, kb = jax.random.split(key, 3)
        bound = 1.0 / (fan_in ** 0.5)
        w = jax.random.uniform(kw, (fan_in, fan_out), jnp.float32, -bound, bound)
        b = jax.random.uniform(kb, (1, fan_out), jnp.float32, -bound, bound)
        params += [w, b]
    return params


if __name__ == "__main__":
    n_observations = 6   # -> layer1 input dim = n_observations + 10 = 16
    n_actions = 4
    batch = 16

    key = jax.random.PRNGKey(0)
    key, kx = jax.random.split(key)
    x = jax.random.normal(kx, (batch, n_observations + 10), jnp.float32)

    params = init_params(key, n_observations, n_actions)
    prepared = prepare_params(params)   # hoisted pad/cast, done once

    # With batch=16 this picks TB=8 -> grid of 2 steps (exercises the
    # multi-step / megacore path even at this tiny size).
    q_values = dqn_forward(x, prepared)
    jax.block_until_ready(q_values)

    # Cross-check against a plain-JAX reference using the same bf16 MXU path
    # (bf16 operands, f32 accumulation, f32 bias + ReLU). The kernel output is
    # stored as bf16, so allow bf16-rounding-level tolerance.
    # TODO(synk): confirm the RL training loop tolerates bf16 activations/output
    # (a pure f32 PyTorch DQN differs by more than matmul rounding).
    w1, b1, w2, b2, w3, b3 = params
    bf = jnp.bfloat16
    h = jnp.maximum(jnp.dot(x.astype(bf), w1.astype(bf),
                            preferred_element_type=jnp.float32) + b1, 0.0)
    h = jnp.maximum(jnp.dot(h.astype(bf), w2.astype(bf),
                            preferred_element_type=jnp.float32) + b2, 0.0)
    ref = jnp.dot(h.astype(bf), w3.astype(bf),
                  preferred_element_type=jnp.float32) + b3

    assert q_values.shape == (batch, n_actions)
    assert jnp.allclose(q_values, ref, atol=1e-2, rtol=1e-2)

    print("KERNEL_OK")
</pallas_src>

<mosaic_0001>
module attributes {stable_mosaic.version = 11 : i64} {
  func.func @dqn_kernel(%arg0: i32, %arg1: memref<8x16xf32, #tpu.memory_space<vmem>>, %arg2: memref<16x128xbf16, #tpu.memory_space<vmem>>, %arg3: memref<1x128xf32, #tpu.memory_space<vmem>>, %arg4: memref<128x128xbf16, #tpu.memory_space<vmem>>, %arg5: memref<1x128xf32, #tpu.memory_space<vmem>>, %arg6: memref<128x128xbf16, #tpu.memory_space<vmem>>, %arg7: memref<1x128xf32, #tpu.memory_space<vmem>>, %arg8: memref<8x128xbf16, #tpu.memory_space<vmem>>) attributes {dimension_semantics = [#tpu.dimension_semantics<parallel>], iteration_bounds = array<i64: 2>, scalar_prefetch = 0 : i64, scratch_operands = 0 : i64, tpu.core_type = #tpu.core_type<tc>, window_params = [{transform_indices = @transform_0, window_bounds = array<i64: 8, 16>}, {pipeline_mode = #tpu.pipeline_mode<synchronous>, transform_indices = @transform_1, window_bounds = array<i64: 16, 128>}, {pipeline_mode = #tpu.pipeline_mode<synchronous>, transform_indices = @transform_2, window_bounds = array<i64: 1, 128>}, {pipeline_mode = #tpu.pipeline_mode<synchronous>, transform_indices = @transform_3, window_bounds = array<i64: 128, 128>}, {pipeline_mode = #tpu.pipeline_mode<synchronous>, transform_indices = @transform_4, window_bounds = array<i64: 1, 128>}, {pipeline_mode = #tpu.pipeline_mode<synchronous>, transform_indices = @transform_5, window_bounds = array<i64: 128, 128>}, {pipeline_mode = #tpu.pipeline_mode<synchronous>, transform_indices = @transform_6, window_bounds = array<i64: 1, 128>}, {transform_indices = @transform_7, window_bounds = array<i64: 8, 128>}]} {
    %c0 = arith.constant 0 : index
    %c0_0 = arith.constant 0 : index
    %0 = vector.load %arg1[%c0, %c0_0] : memref<8x16xf32, #tpu.memory_space<vmem>>, vector<8x16xf32>
    %1 = arith.truncf %0 : vector<8x16xf32> to vector<8x16xbf16>
    %c0_1 = arith.constant 0 : index
    %c0_2 = arith.constant 0 : index
    %2 = vector.load %arg2[%c0_1, %c0_2] : memref<16x128xbf16, #tpu.memory_space<vmem>>, vector<16x128xbf16>
    %cst = arith.constant dense<0.000000e+00> : vector<8x128xf32>
    %3 = tpu.matmul %1, %2, %cst {dimension_numbers = #tpu.dot_dimension_numbers<[1], [0], [0], [1], [0, 0, 1, 1], [], []>} : vector<8x16xbf16>, vector<16x128xbf16>, vector<8x128xf32> -> vector<8x128xf32>
    %c0_3 = arith.constant 0 : index
    %c0_4 = arith.constant 0 : index
    %4 = vector.load %arg3[%c0_3, %c0_4] : memref<1x128xf32, #tpu.memory_space<vmem>>, vector<1x128xf32>
    %5 = vector.broadcast %4 : vector<1x128xf32> to vector<8x128xf32>
    %6 = arith.addf %3, %5 : vector<8x128xf32>
    %cst_5 = arith.constant 0.000000e+00 : f32
    %7 = vector.broadcast %cst_5 : f32 to vector<8x128xf32>
    %8 = arith.maximumf %6, %7 : vector<8x128xf32>
    %9 = arith.truncf %8 : vector<8x128xf32> to vector<8x128xbf16>
    %c0_6 = arith.constant 0 : index
    %c0_7 = arith.constant 0 : index
    %10 = vector.load %arg4[%c0_6, %c0_7] : memref<128x128xbf16, #tpu.memory_space<vmem>>, vector<128x128xbf16>
    %cst_8 = arith.constant dense<0.000000e+00> : vector<8x128xf32>
    %11 = tpu.matmul %9, %10, %cst_8 {dimension_numbers = #tpu.dot_dimension_numbers<[1], [0], [0], [1], [0, 0, 1, 1], [], []>} : vector<8x128xbf16>, vector<128x128xbf16>, vector<8x128xf32> -> vector<8x128xf32>
    %c0_9 = arith.constant 0 : index
    %c0_10 = arith.constant 0 : index
    %12 = vector.load %arg5[%c0_9, %c0_10] : memref<1x128xf32, #tpu.memory_space<vmem>>, vector<1x128xf32>
    %13 = vector.broadcast %12 : vector<1x128xf32> to vector<8x128xf32>
    %14 = arith.addf %11, %13 : vector<8x128xf32>
    %cst_11 = arith.constant 0.000000e+00 : f32
    %15 = vector.broadcast %cst_11 : f32 to vector<8x128xf32>
    %16 = arith.maximumf %14, %15 : vector<8x128xf32>
    %17 = arith.truncf %16 : vector<8x128xf32> to vector<8x128xbf16>
    %c0_12 = arith.constant 0 : index
    %c0_13 = arith.constant 0 : index
    %18 = vector.load %arg6[%c0_12, %c0_13] : memref<128x128xbf16, #tpu.memory_space<vmem>>, vector<128x128xbf16>
    %cst_14 = arith.constant dense<0.000000e+00> : vector<8x128xf32>
    %19 = tpu.matmul %17, %18, %cst_14 {dimension_numbers = #tpu.dot_dimension_numbers<[1], [0], [0], [1], [0, 0, 1, 1], [], []>} : vector<8x128xbf16>, vector<128x128xbf16>, vector<8x128xf32> -> vector<8x128xf32>
    %c0_15 = arith.constant 0 : index
    %c0_16 = arith.constant 0 : index
    %20 = vector.load %arg7[%c0_15, %c0_16] : memref<1x128xf32, #tpu.memory_space<vmem>>, vector<1x128xf32>
    %21 = vector.broadcast %20 : vector<1x128xf32> to vector<8x128xf32>
    %22 = arith.addf %19, %21 : vector<8x128xf32>
    %23 = arith.truncf %22 : vector<8x128xf32> to vector<8x128xbf16>
    %c0_17 = arith.constant 0 : index
    %c0_18 = arith.constant 0 : index
    %24 = vector.load %arg8[%c0_17, %c0_18] : memref<8x128xbf16, #tpu.memory_space<vmem>>, vector<8x128xbf16>
    tpu.vector_store %arg8[%c0_17, %c0_18], %23 {strides = array<i32>} : memref<8x128xbf16, #tpu.memory_space<vmem>>, vector<8x128xbf16>,
    return
  }
  func.func @transform_0(%arg0: i32) -> (i32, i32) {
    %c0_i32 = arith.constant 0 : i32
    %c0_i32_0 = arith.constant 0 : i32
    return %arg0, %c0_i32 : i32, i32
  }
  func.func @transform_1(%arg0: i32) -> (i32, i32) {
    %c0_i32 = arith.constant 0 : i32
    %c0_i32_0 = arith.constant 0 : i32
    %c0_i32_1 = arith.constant 0 : i32
    return %c0_i32, %c0_i32_0 : i32, i32
  }
  func.func @transform_2(%arg0: i32) -> (i32, i32) {
    %c0_i32 = arith.constant 0 : i32
    %c0_i32_0 = arith.constant 0 : i32
    %c0_i32_1 = arith.constant 0 : i32
    return %c0_i32, %c0_i32_0 : i32, i32
  }
  func.func @transform_3(%arg0: i32) -> (i32, i32) {
    %c0_i32 = arith.constant 0 : i32
    %c0_i32_0 = arith.constant 0 : i32
    %c0_i32_1 = arith.constant 0 : i32
    return %c0_i32, %c0_i32_0 : i32, i32
  }
  func.func @transform_4(%arg0: i32) -> (i32, i32) {
    %c0_i32 = arith.constant 0 : i32
    %c0_i32_0 = arith.constant 0 : i32
    %c0_i32_1 = arith.constant 0 : i32
    return %c0_i32, %c0_i32_0 : i32, i32
  }
  func.func @transform_5(%arg0: i32) -> (i32, i32) {
    %c0_i32 = arith.constant 0 : i32
    %c0_i32_0 = arith.constant 0 : i32
    %c0_i32_1 = arith.constant 0 : i32
    return %c0_i32, %c0_i32_0 : i32, i32
  }
  func.func @transform_6(%arg0: i32) -> (i32, i32) {
    %c0_i32 = arith.constant 0 : i32
    %c0_i32_0 = arith.constant 0 : i32
    %c0_i32_1 = arith.constant 0 : i32
    return %c0_i32, %c0_i32_0 : i32, i32
  }
  func.func @transform_7(%arg0: i32) -> (i32, i32) {
    %c0_i32 = arith.constant 0 : i32
    %c0_i32_0 = arith.constant 0 : i32
    return %arg0, %c0_i32 : i32, i32
  }
}

</mosaic_0001>

<bundles_post_ra>
// kernel: tpu_custom_call.1
= control target key start
LH: loop header
LB: loop body
LE: loop exit
PB: predicated region body
PF: predicated region fallthrough
CT: control target
= control target key end

     0   :  { %s1392_s0 = inlined_call_operand.hbm [shape: f32[16,16], index: 0, kind: input, shape index: {}]   ;;  %s1393_s1 = inlined_call_operand.hbm [shape: bf16[16,128], index: 1, kind: input, shape index: {}]   ;;  %s1394_s2 = inlined_call_operand.vmem [shape: f32[1,128], index: 2, kind: input, shape index: {}]   ;;  %s1395_s3 = inlined_call_operand.hbm [shape: bf16[128,128], index: 3, kind: input, shape index: {}]   ;;  %s1396_s4 = inlined_call_operand.vmem [shape: f32[1,128], index: 4, kind: input, shape index: {}]   ;;  %s1397_s5 = inlined_call_operand.hbm [shape: bf16[128,128], index: 5, kind: input, shape index: {}]   ;;  %s1398_s6 = inlined_call_operand.vmem [shape: f32[1,128], index: 6, kind: input, shape index: {}]   ;;  %s1399_s7 = inlined_call_operand.hbm [shape: bf16[16,128], index: 7, kind: output, shape index: {}]  }
   0x1   :  { %1404 = sst [smem:[#allocation15_spill]] %s1393_s1 }
   0x2   :  { %1405 = sst [smem:[#allocation16_spill]] %s1395_s3 }
   0x3   :  { %12 = vsyncpa [#allocation3], 0 }
   0x4   :  { %14 = vsyncpa [#allocation3 + $0x1], 0 }
   0x5   :  { %15 = vsyncpa [#allocation6], 0 }
   0x6   :  { %16 = vsyncpa [#allocation9], 0 }
   0x7   :  { %17 = vsyncpa [#allocation4], 0 }
   0x8   :  { %19 = vsyncpa [#allocation4 + $0x1], 0  ;;  %s1173_s24 = smov 0   ;;  %s1175_s25 = smov 0  }
   0x9   :  { %s1177_s26 = smov 0   ;;  %s1179_s27 = smov 0  }
   0xa LB: > { %s1194_s28 = sadd.s32 4294967295, %s1122_s27   ;;  %s741_s29 = sadd.s32 4294967294, %s1122_s27   ;;  %s1122_s27 = sphi %s1179_s27, %s1427_s27   ;;  %s1118_s26 = sphi %s1177_s26, %s1426_s26   ;;  %s1114_s25 = sphi %s1175_s25, %s1425_s25   ;;  %s1110_s24 = sphi %s1173_s24, %s1424_s24  }
   0xb   : > { %p45_p0 = scmp.ne.s32.totalorder %s1114_s25, %s1110_s24  ;;  %p1400_p1 = scmp.eq.s32.totalorder %s1194_s28, 0 }
   0xc   : > { %p201_p3 = scmp.eq.s32.totalorder %s741_s29, 1  ;;  %p742_p5 = scmp.ge.s32.totalorder %s1122_s27, 1 }
   0xd   : > { %p1203_p4 = por %p1400_p1, %p45_p0  ;;  %p208_p7 = scmp.lt.s32.totalorder %s1122_s27, 3 }
   0xe   : > { %p1208_p6 = por %p201_p3, %p45_p0  ;;  %s1124_s10 = smov [#allocation5]  }
   0xf   : > { %s1406_s30 = scalar_select %p1203_p4, 1, 0 }
  0x10   : > { %s1407_s8 = scalar_select %p1208_p6, 1, 0 }
  0x11   : > { %p1213_p8 = pnand %p742_p5, %p208_p7  ;;  %s220_s11 = sshll.u32 %s1124_s10, 4  ;;  %s221_s11 = int_to_ptr.vmem [resolvable:$true] %s220_s11 }
  0x12   : > { %s1125_s13 = smov [#allocation7]   ;;  %s1126_s15 = smov [#allocation8]  }
  0x13   : > { %s1408_s9 = scalar_select %p1213_p8, 1, 0 }
  0x14   : > { %p862_p9 = pneg %p1213_p8  ;;  %s236_s14 = sshll.u32 %s1125_s13, 4  ;;  %s237_s14 = int_to_ptr.vmem [resolvable:$true] %s236_s14 }
  0x15   : > { %s252_s16 = sshll.u32 %s1126_s15, 4  ;;  %s955_s17 = scalar_lea.vmem %s221_s11, 128  ;;  %s253_s16 = int_to_ptr.vmem [resolvable:$true] %s252_s16 }
  0x16   : > { %p1222_p11 = pnand %p862_p9, %p1400_p1  ;;  %p956_p13 = scmp.ne.s32.totalorder %s221_s11, %s955_s17 }
  0x17   : > { %p963_p5 = scmp.lt.s32.totalorder %s221_s11, %s221_s11  ;;  %p964_p7 = scmp.lt.s32.totalorder %s955_s17, %s955_s17 }
  0x18   : > { %p946_p12 = pneg %p1222_p11 }
  0x19   : > { %p965_p9 = por %p964_p7, %p963_p5 }
  0x1a   : > { %p958_p0 = pnand %p956_p13, %p946_p12 }
  0x1c   : > { %p959_p3 = pneg %p958_p0 }
  0x1e   : > { %p966_p10 = pnand %p965_p9, %p959_p3 }
  0x20   : > { %969 = shalt.err (!%p966_p10)
}
  0x21   : > { %s1127_s18 = smov 64   ;;  %s1128_s19 = smov 4  }
  0x22   : > { %s1410_s1 = sld [smem:[#allocation15_spill]]  ;;  %s981_s22 = scalar_lea.vmem %s237_s14, 1024 }
  0x23   : > { %p982_p1 = scmp.ne.s32.totalorder %s237_s14, %s981_s22  ;;  %p989_p2 = scmp.lt.s32.totalorder %s237_s14, %s237_s14 }
  0x24   : > { %p990_p6 = scmp.lt.s32.totalorder %s981_s22, %s981_s22 }
  0x25   : > { %p984_p13 = pnand %p982_p1, %p946_p12 }
  0x26   : > { %p991_p5 = por %p990_p6, %p989_p2 }
  0x27   : > { %p985_p0 = pneg %p984_p13 }
  0x28   : > { %865 = dma.hbm_to_vmem [thread:$0]  (!%p1222_p11), %s1410_s1, 128, %s221_s11, [#allocation6], %s1127_s18, %s1127_s18, %s1128_s19  }
  0x29   : > { %p992_p3 = pnand %p991_p5, %p985_p0 }
  0x2b   : > { %995 = shalt.err (!%p992_p3)
}
  0x2c   : > { %s1411_s3 = sld [smem:[#allocation16_spill]]  ;;  %s1007_s10 = scalar_lea.vmem %s253_s16, 1024 }
  0x2d   : > { %p1008_p10 = scmp.ne.s32.totalorder %s253_s16, %s1007_s10  ;;  %p1015_p9 = scmp.lt.s32.totalorder %s253_s16, %s253_s16 }
  0x2e   : > { %p1016_p13 = scmp.lt.s32.totalorder %s1007_s10, %s1007_s10 }
  0x2f   : > { %p1010_p7 = pnand %p1008_p10, %p946_p12 }
  0x30   : > { %p1017_p4 = por %p1016_p13, %p1015_p9 }
  0x31   : > { %p1011_p1 = pneg %p1010_p7 }
  0x32   : > { %868 = dma.hbm_to_vmem [thread:$0]  (!%p1222_p11), %s1411_s3, 1024, %s237_s14, [#allocation6], %s1127_s18, %s1127_s18, %s1128_s19  }
  0x33   : > { %p1018_p2 = pnand %p1017_p4, %p1011_p1 }
  0x35   : > { %1021 = shalt.err (!%p1018_p2)
}
  0x36   : > { %871 = dma.hbm_to_vmem [thread:$0]  (!%p1222_p11), %s1397_s5, 1024, %s253_s16, [#allocation9], %s1127_s18, %s1127_s18, %s1128_s19  }
  0x37   : > { %s1253_s14 = sadd.s32 1, %s1122_s27   ;;  %s32_s12 = sadd.s32 1, %s1118_s26 }
  0x38   : > { %s29_s15 = ssub.s32 %s1122_s27, %s1253_s14  ;;  %p39_p6 = scmp.ne.s32.totalorder %s1118_s26, %s1114_s25 }
  0x39   : > { %p30_p4 = scmp.eq.s32.totalorder %s29_s15, 0  ;;  %p40_p12 = scmp.eq.s32.totalorder %s1122_s27, 0 }
  0x3a   : > { %p883_p0 = scmp.lt.s32.totalorder %s1122_s27, 2  ;;  %p1412_p3 = scmp.eq.s32.totalorder %s1194_s28, 1 }
  0x3b   : > { %s1263_s17 = scalar_select %p30_p4, %s1118_s26, %s32_s12  }
  0x3c   : > { %p41_p5 = por %p40_p12, %p39_p6  ;;  %p1267_p10 = por %p1412_p3, %p39_p6 }
  0x3d   : > { %s269_s21 = sand.u32 1, %s1118_s26   ;;  %s748_s22 = sshll.u32 %s1122_s27, 7 }
  0x3e   : > { %s1413_s20 = scalar_select %p1267_p10, 1, 0 }
  0x3f   : > { %s747_s16 = sshll.u32 %s269_s21, 3  ;;  %s1276_s23 = scalar_lea.hbm %s1392_s0, %s748_s22 }
  0x40   : > { %s273_s29 = scalar_lea.vmem [#allocation2], %s747_s16  ;;  %p1278_p11 = pnand %p883_p0, %p41_p5 }
  0x41   : > { %s280_s10 = sshll.u32 %s273_s29, 4  ;;  %s270_s13 = scalar_lea.sflag [#allocation3], %s269_s21  ;;  %s281_s10 = int_to_ptr.vmem [resolvable:$true] %s280_s10 }
  0x42   : > { %s1022_s15 = scalar_lea.hbm %s1276_s23, 128  ;;  %p1024_p1 = pneg %p1278_p11 }
  0x43   : > { %p1023_p7 = scmp.ne.s32.totalorder %s1276_s23, %s1022_s15  ;;  %s1027_s18 = scalar_lea.hbm %s1392_s0, 256 }
  0x44   : > { %p1028_p2 = scmp.lt.s32.totalorder %s1276_s23, %s1392_s0  ;;  %p1029_p4 = scmp.lt.s32.totalorder %s1027_s18, %s1022_s15 }
  0x45   : > { %p1025_p9 = pnand %p1024_p1, %p1023_p7 }
  0x46   : > { %p1030_p6 = por %p1029_p4, %p1028_p2 }
  0x47   : > { %p1026_p13 = pneg %p1025_p9 }
  0x49   : > { %p1031_p12 = pnand %p1030_p6, %p1026_p13 }
  0x4b   : > { %1034 = shalt.err (!%p1031_p12)
}
  0x4c   : > { %s1035_s29 = scalar_lea.vmem %s281_s10, 128  ;;  %s1129_s21 = smov [#allocation2]  }
  0x4d   : > { %p1036_p0 = scmp.ne.s32.totalorder %s281_s10, %s1035_s29  ;;  %s1040_s1 = sshll.u32 %s1129_s21, 4  ;;  %s1041_s1 = int_to_ptr.vmem [resolvable:$false] %s1040_s1 }
  0x4e   : > { %s1042_s3 = scalar_lea.vmem %s1041_s1, 256  ;;  %p1043_p7 = scmp.lt.s32.totalorder %s281_s10, %s1041_s1 }
  0x4f   : > { %p1038_p5 = pnand %p1036_p0, %p1024_p1  ;;  %p1044_p9 = scmp.lt.s32.totalorder %s1042_s3, %s1035_s29 }
  0x51   : > { %p1039_p3 = pneg %p1038_p5  ;;  %p1045_p10 = por %p1044_p9, %p1043_p7 }
  0x53   : > { %p1046_p8 = pnand %p1045_p10, %p1039_p3 }
  0x55   : > { %1049 = shalt.err (!%p1046_p8)
}
  0x56   : > { %875 = dma.hbm_to_vmem [thread:$0]  (!%p1278_p11), %s1276_s23, 128, %s281_s10, %s270_s13  }
  0x57   : > { %p1415_p13 = scmp.ne.s32.totalorder %s1408_s9, 0 }
  0x58   : > { %s1299_s15 = sand.u32 (!%p1415_p13), 1, %s1114_s25   ;;  %p1416_p1 = scmp.ne.s32.totalorder (!%p1415_p13), %s1406_s30, 0 }
  0x59   : > { %289 = sbr.rel (%p1415_p13) target bundleno = 716 (0x2cc), region = 48  ;;  %s750_s12 = sshll.u32 (!%p1415_p13), %s1299_s15, 3 }
  0x5a   : > { %s292_s22 = scalar_lea.sflag (!%p1415_p13), [#allocation3], %s1299_s15  ;;  %s295_s1 = scalar_lea.vmem (!%p1415_p13), [#allocation2], %s750_s12 }
  0x5e   : > { %1093 = dma.done.wait (%p1416_p1), %s292_s22, 128  }
  0x5f   : > { %1095 = vsyncadd (%p1416_p1), %s292_s22, 4294967168  ;;  %p1417_p8 = scmp.eq.s32.totalorder %s1194_s28, 0 }
  0x61   : > { %1097 = dma.done.wait (%p1417_p8), [#allocation6], 1152   ;;  %p1418_p10 = pmov %p1417_p8 }
  0x62   : > { %p1419_p11 = pmov %p1417_p8 }
  0x63   : > { %1099 = vsyncadd (%p1418_p10), [#allocation6], 4294966144 }
  0x64   : > { %1101 = dma.done.wait (%p1419_p11), [#allocation9], 1024   ;;  %p1420_p2 = pmov %p1417_p8 }
  0x65   : > { %v1130_v0 = vmov 0.0   ;;  %vm1131_vm0 = vmmov 0   ;;  %v927_v1 = vld [vmem:[#allocation5] sm:$0xff]   ;;  %v339_v2 = vld [vmem:[%s295_s1] sm:$0xff]  ;;  %vm356_vm1 = vcmask 130048   ;;  %v931_v7 = vld [vmem:[#allocation7 + $0x20] sm:$0xff]  }
  0x66   : > { %1103 = vsyncadd (%p1420_p2), [#allocation9], 4294966272  ;;  %800 = vmatprep.subr.bf16.mxu0 %v1130_v0  ;;  %802 = vmatprep.mubr.msk.bf16.mxu0 %vm1131_vm0, %v1130_v0  ;;  %v340_v3 = vpack.c.bf16 %v339_v2, %v339_v2  ;;  %v928_v4 = vld [vmem:[#allocation7 + $0x38] sm:$0xff]   ;;  %v929_v5 = vld [vmem:[#allocation7 + $0x30] sm:$0xff]   ;;  %s754_s10 = sshll.u32 %s1299_s15, 2  ;;  %s777_s18 = sshll.u32 %s1194_s28, 6 }
  0x67   : > { %806 = vmatprep.subr.bf16.mxu1 %v1130_v0  ;;  %822 = vmatprep.mubr.msk.bf16.mxu1 %vm1131_vm0, %v1130_v0  ;;  %v930_v6 = vld [vmem:[#allocation7 + $0x28] sm:$0xff]   ;;  %v932_v8 = vld [vmem:[#allocation7 + $0x18] sm:$0xff]   ;;  %v933_v9 = vld [vmem:[#allocation7 + $0x10] sm:$0xff]   ;;  %s337_s19 = scalar_lea.vmem [#allocation10], %s754_s10  ;;  %s1349_s12 = scalar_lea.hbm %s1399_s7, %s777_s18 }
  0x68   : > { %801 = vmatpush3.bf16.msra.mxu0 %v927_v1  ;;  %807 = vmatpush3.bf16.msra.mxu1 %v928_v4  ;;  %v934_v10 = vld [vmem:[#allocation7 + $0x8] sm:$0xff]   ;;  %v935_v11 = vld [vmem:[#allocation7] sm:$0xff]   ;;  %v936_v12 = vld [vmem:[#allocation8 + $0x38] sm:$0xff]   ;;  %s642_s16 = sshll.u32 %s337_s19, 4  ;;  %s629_s22 = scalar_lea.sflag [#allocation4], %s1299_s15  ;;  %s1351_s16 = int_to_ptr.vmem [resolvable:$true] %s642_s16 }
  0x69   : > { %826 = vmatprep.subr.bf16.mxu0 %v1130_v0  ;;  %808 = vmatprep.subr.bf16.mxu1 %v1130_v0  ;;  %v937_v13 = vld [vmem:[#allocation8 + $0x30] sm:$0xff]   ;;  %v938_v14 = vld [vmem:[#allocation8 + $0x28] sm:$0xff]   ;;  %v939_v15 = vld [vmem:[#allocation8 + $0x20] sm:$0xff]   ;;  %s1050_s28 = scalar_lea.vmem %s1351_s16, 64  ;;  %p1421_p6 = scmp.ne.s32.totalorder %s1413_s20, 0 }
  0x6a   : > { %v940_v16 = vld [vmem:[#allocation8 + $0x18] sm:$0xff]   ;;  %v941_v17 = vld [vmem:[#allocation8 + $0x10] sm:$0xff]   ;;  %v755_v18 = vld [vmem:[%s1394_s2] ss:$0 sm:$0xff]  ;;  %p1051_p4 = scmp.ne.s32.totalorder %s1351_s16, %s1050_s28  ;;  %s1132_s1 = smov [#allocation10]  }
  0x6b   : > { %803 = vmatmul.mubr.msk.bf16.vlgmr.msra.gmra.mxu0 %vm356_vm1, %v340_v3  ;;  %v942_v26 = vld [vmem:[#allocation8 + $0x8] sm:$0xff]   ;;  %v943_v27 = vld [vmem:[#allocation8] sm:$0xff]   ;;  %s1054_s3 = sshll.u32 %s1132_s1, 4  ;;  %s1055_s3 = int_to_ptr.vmem [resolvable:$false] %s1054_s3 }
  0x6c   : > { %842 = vmatprep.mubr.msk.bf16.mxu0 %vm1131_vm0, %v1130_v0  ;;  %809 = vmatpush3.bf16.msra.mxu1 %v929_v5  ;;  %v758_v28 = vld [vmem:[%s1396_s4] ss:$0 sm:$0xff]  ;;  %p1052_p12 = pnand %p1051_p4, %p1421_p6  ;;  %s1056_s30 = scalar_lea.vmem %s1055_s3, 128 }
  0x6d   : > { %810 = vmatprep.subr.bf16.mxu1 %v1130_v0  ;;  %827 = vmatpush3.bf16.msra.mxu0 %v936_v12  ;;  %v767_v36 = vld [vmem:[%s1398_s6] ss:$0 sm:$0xff]  ;;  %p1057_p5 = scmp.lt.s32.totalorder %s1351_s16, %s1055_s3  ;;  %p1058_p3 = scmp.lt.s32.totalorder %s1056_s30, %s1050_s28 }
  0x6e   : > { %828 = vmatprep.subr.bf16.mxu0 %v1130_v0  ;;  %p1053_p0 = pneg %p1052_p12 }
  0x6f   : > { %p1059_p7 = por %p1058_p3, %p1057_p5 }
  0x70   : > { %811 = vmatpush3.bf16.msra.mxu1 %v930_v6 }
  0x71   : > { %812 = vmatprep.subr.bf16.mxu1 %v1130_v0  ;;  %829 = vmatpush3.bf16.msra.mxu0 %v937_v13  ;;  %p1060_p9 = pnand %p1059_p7, %p1053_p0 }
  0x72   : > { %830 = vmatprep.subr.bf16.mxu0 %v1130_v0 }
  0x74   : > { %813 = vmatpush3.bf16.msra.mxu1 %v931_v7 }
  0x75   : > { %814 = vmatprep.subr.bf16.mxu1 %v1130_v0  ;;  %831 = vmatpush3.bf16.msra.mxu0 %v938_v14 }
  0x76   : > { %832 = vmatprep.subr.bf16.mxu0 %v1130_v0 }
  0x78   : > { %815 = vmatpush3.bf16.msra.mxu1 %v932_v8 }
  0x79   : > { %816 = vmatprep.subr.bf16.mxu1 %v1130_v0  ;;  %833 = vmatpush3.bf16.msra.mxu0 %v939_v15 }
  0x7a   : > { %834 = vmatprep.subr.bf16.mxu0 %v1130_v0 }
  0x7c   : > { %817 = vmatpush3.bf16.msra.mxu1 %v933_v9 }
  0x7d   : > { %818 = vmatprep.subr.bf16.mxu1 %v1130_v0  ;;  %835 = vmatpush3.bf16.msra.mxu0 %v940_v16 }
  0x7e   : > { %836 = vmatprep.subr.bf16.mxu0 %v1130_v0 }
  0x80   : > { %819 = vmatpush3.bf16.msra.mxu1 %v934_v10 }
  0x81   : > { %820 = vmatprep.subr.bf16.mxu1 %v1130_v0  ;;  %837 = vmatpush3.bf16.msra.mxu0 %v941_v17 }
  0x82   : > { %838 = vmatprep.subr.bf16.mxu0 %v1130_v0 }
  0x84   : > { %821 = vmatpush3.bf16.msra.mxu1 %v935_v11 }
  0x85   : > { %839 = vmatpush3.bf16.msra.mxu0 %v942_v26 }
  0x86   : > { %840 = vmatprep.subr.bf16.mxu0 %v1130_v0 }
  0x89   : > { %841 = vmatpush3.bf16.msra.mxu0 %v943_v27 }
 0x12b   : > { %v394_v19 = vpop.f32.mrf.mxu0 }
 0x12c   : > { %v395_v20 = vadd.f32 %v755_v18, %v394_v19 }
 0x12d   : > { %v804_v21 = vpop.f32.mrf.mxu0 }
 0x12e   : > { %v400_v22 = vmax.f32 %v395_v20, 0.0 }
 0x12f   : > { %v397_v23 = vpop.f32.mrf.mxu0 }
 0x130   : > { %v401_v24 = vpack.c.bf16 %v400_v22, %v400_v22 }
 0x131   : > { %v805_v25 = vpop.f32.mrf.mxu0 }
 0x132   : > { %823 = vmatmul.mubr.bf16.vlgmr.msra.gmra.mxu1 %v401_v24 }
 0x1f2   : > { %v507_v29 = vpop.f32.mrf.mxu1 }
 0x1f3   : > { %v508_v30 = vadd.f32 %v758_v28, %v507_v29 }
 0x1f4   : > { %v824_v31 = vpop.f32.mrf.mxu1 }
 0x1f5   : > { %v513_v32 = vmax.f32 %v508_v30, 0.0 }
 0x1f6   : > { %v510_v33 = vpop.f32.mrf.mxu1 }
 0x1f7   : > { %v514_v34 = vpack.c.bf16 %v513_v32, %v513_v32 }
 0x1f8   : > { %v825_v35 = vpop.f32.mrf.mxu1 }
 0x1f9   : > { %843 = vmatmul.mubr.bf16.vlgmr.msra.gmra.mxu0 %v514_v34 }
 0x2b9   : > { %v620_v37 = vpop.f32.mrf.mxu0 }
 0x2ba   : > { %v621_v38 = vadd.f32 %v767_v36, %v620_v37 }
 0x2bb   : > { %v844_v39 = vpop.f32.mrf.mxu0 }
 0x2bc   : > { %v626_v40 = vpack.c.bf16 %v621_v38, %v621_v38 }
 0x2bd   : > { %v623_v41 = vpop.f32.mrf.mxu0 }
 0x2be   : > { %627 = vst [vmem:[%s337_s19] sm:$0xf] %v626_v40 }
 0x2bf   : > { %v845_v42 = vpop.f32.mrf.mxu0 }
 0x2c0   : > { %1063 = shalt.err (!%p1060_p9)
}
 0x2c1   : > { %s1064_s9 = scalar_lea.hbm %s1349_s12, 64  ;;  %s1068_s10 = scalar_lea.hbm %s1399_s7, 128 }
 0x2c2   : > { %p1065_p13 = scmp.ne.s32.totalorder %s1349_s12, %s1064_s9  ;;  %p1069_p10 = scmp.lt.s32.totalorder %s1349_s12, %s1399_s7 }
 0x2c3   : > { %p1070_p11 = scmp.lt.s32.totalorder %s1068_s10, %s1064_s9 }
 0x2c4   : > { %p1066_p1 = pnand %p1065_p13, %p1421_p6 }
 0x2c5   : > { %p1071_p2 = por %p1070_p11, %p1069_p10 }
 0x2c6   : > { %p1067_p8 = pneg %p1066_p1 }
 0x2c8   : > { %p1072_p4 = pnand %p1071_p2, %p1067_p8 }
 0x2ca   : > { %1075 = shalt.err (!%p1072_p4)
}
 0x2cb   : > { %860 = dma.vmem_to_hbm [thread:$0]  (%p1421_p6), %s1351_s16, 64, %s1349_s12, %s629_s22  }
 0x2cc PF: > { %s654_s18 = sand.u32 1, %s1110_s24   ;;  %p1422_p12 = scmp.ne.s32.totalorder %s1407_s8, 0 }
 0x2cd   : > { %p1423_p0 = scmp.ge.s32.totalorder %s1122_s27, 2  ;;  %s655_s19 = scalar_lea.sflag [#allocation4], %s654_s18 }
 0x2cf   : > { %p877_p5 = pnand %p1423_p0, %p1422_p12 }
 0x2d1   : > { %p878_p3 = pneg %p877_p5 }
 0x2d3   : > { %1105 = dma.done.wait (%p878_p3), %s655_s19, 64  }
 0x2d4   : > { %1107 = vsyncadd (%p878_p3), %s655_s19, 4294967232  ;;  %p22_p7 = scmp.ge.s32.totalorder %s1253_s14, 4   ;;  %s1424_s24 = smov %s1114_s25 }
 0x2d5   : > { %s1425_s25 = smov %s1118_s26  ;;  %s1426_s26 = smov %s1263_s17 }
 0x2d6   : > { %s1427_s27 = smov %s1253_s14  ;;  %24 = sbr.rel (!%p22_p7) target bundleno = 10 (0xa), region = 105 }
 0x2db   :  { %660 = vsyncpa [#allocation3], 1 }
 0x2dc   :  { %662 = vsyncpa [#allocation3 + $0x1], 1 }
 0x2dd   :  { %663 = vsyncpa [#allocation6], 1 }
 0x2de   :  { %664 = vsyncpa [#allocation9], 1 }
 0x2df   :  { %665 = vsyncpa [#allocation4], 1 }
 0x2e0   :  { %667 = vsyncpa [#allocation4 + $0x1], 1 }

</bundles_post_ra>
